<compile_context>
chip_gen: v7x
topology: tpu7x:2x2x1
jax: 0.10.0
libtpu: 0.0.40
codegen_flags: <defaults>
</compile_context>

<pallas_src>
import jax
import jax.numpy as jnp
from jax.experimental import pallas as pl
from jax.experimental.pallas import tpu as pltpu

QMIN = 0.0
QMAX = 255.0
LANE = 128


def _fake_quant_kernel(s_ref, zp_ref, x_ref, o_ref):
    # scale / zero_point live in SMEM as shape-(1,) f32 scalars.
    s = s_ref[0]
    zp = zp_ref[0]
    inv_s = 1.0 / s  # scalar, once per grid step; matches torch's inv_scale formulation
    x = x_ref[...].astype(jnp.float32)
    # round-half-to-even matches torch.fake_quantize_per_tensor_affine (nearbyint)
    q = jnp.round(x * inv_s + zp)
    q = jnp.clip(q, QMIN, QMAX)
    o_ref[...] = ((q - zp) * s).astype(o_ref.dtype)


def fake_quantize_per_tensor_affine(x, scale, zero_point):
    """x: any-shape array; scale, zero_point: shape-(1,) arrays. qmin=0, qmax=255."""
    orig_shape = x.shape
    orig_dtype = x.dtype

    flat = x.reshape(-1)  # free for contiguous arrays; dtype kept native
    n = flat.shape[0]

    # Pad only to a multiple of the 128-lane width (not a full tile) and only if needed.
    rem = n % LANE
    padded = n if rem == 0 else n + (LANE - rem)
    if padded != n:
        flat = jnp.pad(flat, (0, padded - n))
    rows = padded // LANE
    x2d = flat.reshape(rows, LANE)

    # Tile selection: ~1 MiB per input tile (v7x-safe; 2 bufs x (in+out) x 1 MiB = 4 MiB
    # of VMEM, far under the 32 MiB scoped default on every generation).
    bytes_per_row = LANE * jnp.dtype(orig_dtype).itemsize
    target_rows = max(8, (1 << 20) // bytes_per_row)
    if rows <= target_rows:
        br = rows                      # single block equal to full array dims
    else:
        br = (target_rows // 8) * 8    # keep sublane (8) alignment; last block may be partial
    grid = (pl.cdiv(rows, br),)

    out2d = pl.pallas_call(
        _fake_quant_kernel,
        out_shape=jax.ShapeDtypeStruct((rows, LANE), orig_dtype),
        grid=grid,
        in_specs=[
            pl.BlockSpec(memory_space=pltpu.MemorySpace.SMEM),   # scale
            pl.BlockSpec(memory_space=pltpu.MemorySpace.SMEM),   # zero_point
            pl.BlockSpec((br, LANE), lambda i: (i, 0)),          # input row tile
        ],
        out_specs=pl.BlockSpec((br, LANE), lambda i: (i, 0)),    # lane-dense output tile
        compiler_params=pltpu.CompilerParams(
            dimension_semantics=("parallel",),                   # shard rows across TCs (v7x)
        ),
    )(scale.astype(jnp.float32), zero_point.astype(jnp.float32), x2d)

    out_flat = out2d.reshape(-1)
    if padded != n:
        out_flat = out_flat[:n]
    return out_flat.reshape(orig_shape)


class FakeQuantizeTensorQParamPerTensor:
    """JAX/Pallas port of the PyTorch module: scale=1, zero_point=0, qmin=0, qmax=255."""

    def __call__(self, x):
        s = jnp.ones((1,), dtype=jnp.float32)
        zp = jnp.zeros((1,), dtype=jnp.float32)
        return fake_quantize_per_tensor_affine(x, s, zp)


if __name__ == "__main__":
    key = jax.random.PRNGKey(0)
    # matches the module's get_example_inputs(): randn(1, 3, 32, 32)
    x = jax.random.normal(key, (1, 3, 32, 32), dtype=jnp.float32)

    mod = FakeQuantizeTensorQParamPerTensor()
    out = mod(x)
    out = jax.block_until_ready(out)

    # reference check in plain JAX (scale=1, zp=0, qmin=0, qmax=255)
    ref = jnp.clip(jnp.round(x), QMIN, QMAX)
    assert out.shape == x.shape and out.dtype == x.dtype
    assert jnp.allclose(out, ref, atol=0.0), "mismatch vs reference"

    print("KERNEL_OK")
</pallas_src>

<mosaic_0001>
module attributes {stable_mosaic.version = 11 : i64} {
  func.func @_fake_quant_kernel(%arg0: i32, %arg1: memref<1xf32, #tpu.memory_space<smem>>, %arg2: memref<1xf32, #tpu.memory_space<smem>>, %arg3: memref<24x128xf32, #tpu.memory_space<vmem>>, %arg4: memref<24x128xf32, #tpu.memory_space<vmem>>) attributes {dimension_semantics = [#tpu.dimension_semantics<parallel>], iteration_bounds = array<i64: 1>, scalar_prefetch = 0 : i64, scratch_operands = 0 : i64, tpu.core_type = #tpu.core_type<tc>, window_params = [{transform_indices = @transform_0, window_bounds = array<i64: 1>}, {transform_indices = @transform_1, window_bounds = array<i64: 1>}, {transform_indices = @transform_2, window_bounds = array<i64: 24, 128>}, {transform_indices = @transform_3, window_bounds = array<i64: 24, 128>}]} {
    %c0 = arith.constant 0 : index
    %0 = memref.load %arg1[%c0] : memref<1xf32, #tpu.memory_space<smem>>
    %c0_0 = arith.constant 0 : index
    %1 = memref.load %arg2[%c0_0] : memref<1xf32, #tpu.memory_space<smem>>
    %cst = arith.constant 1.000000e+00 : f32
    %2 = arith.divf %cst, %0 : f32
    %c0_1 = arith.constant 0 : index
    %c0_2 = arith.constant 0 : index
    %3 = vector.load %arg3[%c0_1, %c0_2] : memref<24x128xf32, #tpu.memory_space<vmem>>, vector<24x128xf32>
    %4 = vector.broadcast %2 : f32 to vector<24x128xf32>
    %5 = arith.mulf %3, %4 : vector<24x128xf32>
    %6 = vector.broadcast %1 : f32 to vector<24x128xf32>
    %7 = arith.addf %5, %6 : vector<24x128xf32>
    %8 = math.roundeven %7 : vector<24x128xf32>
    %cst_3 = arith.constant 0.000000e+00 : f32
    %cst_4 = arith.constant 2.550000e+02 : f32
    %9 = vector.broadcast %cst_3 : f32 to vector<24x128xf32>
    %10 = arith.maximumf %9, %8 : vector<24x128xf32>
    %11 = vector.broadcast %cst_4 : f32 to vector<24x128xf32>
    %12 = arith.minimumf %11, %10 : vector<24x128xf32>
    %13 = vector.broadcast %1 : f32 to vector<24x128xf32>
    %14 = arith.subf %12, %13 : vector<24x128xf32>
    %15 = vector.broadcast %0 : f32 to vector<24x128xf32>
    %16 = arith.mulf %14, %15 : vector<24x128xf32>
    %c0_5 = arith.constant 0 : index
    %c0_6 = arith.constant 0 : index
    %17 = vector.load %arg4[%c0_5, %c0_6] : memref<24x128xf32, #tpu.memory_space<vmem>>, vector<24x128xf32>
    tpu.vector_store %arg4[%c0_5, %c0_6], %16 {strides = array<i32>} : memref<24x128xf32, #tpu.memory_space<vmem>>, vector<24x128xf32>,
    return
  }
  func.func @transform_0(%arg0: i32) -> i32 {
    %c0_i32 = arith.constant 0 : i32
    %c0_i32_0 = arith.constant 0 : i32
    return %c0_i32 : i32
  }
  func.func @transform_1(%arg0: i32) -> i32 {
    %c0_i32 = arith.constant 0 : i32
    %c0_i32_0 = arith.constant 0 : i32
    return %c0_i32 : i32
  }
  func.func @transform_2(%arg0: i32) -> (i32, i32) {
    %c0_i32 = arith.constant 0 : i32
    %c0_i32_0 = arith.constant 0 : i32
    return %arg0, %c0_i32 : i32, i32
  }
  func.func @transform_3(%arg0: i32) -> (i32, i32) {
    %c0_i32 = arith.constant 0 : i32
    %c0_i32_0 = arith.constant 0 : i32
    return %arg0, %c0_i32 : i32, i32
  }
}

</mosaic_0001>

<bundles_post_ra>
// kernel: tpu_custom_call.1
= control target key start
LH: loop header
LB: loop body
LE: loop exit
PB: predicated region body
PF: predicated region fallthrough
CT: control target
= control target key end

     0   :  { %10 = vsyncpa [#allocation5], 0  ;;  %s202_s0 = inlined_call_operand.<no memory space> [shape: f32[1], index: 0, kind: input, shape index: {}]   ;;  %s203_s1 = inlined_call_operand.<no memory space> [shape: f32[1], index: 1, kind: input, shape index: {}]   ;;  %s204_s2 = inlined_call_operand.hbm [shape: f32[24,128], index: 2, kind: input, shape index: {}]   ;;  %s205_s3 = inlined_call_operand.hbm [shape: f32[24,128], index: 3, kind: output, shape index: {}]  }
   0x1   :  { %11 = vsyncpa [#allocation6], 0  ;;  %s142_s12 = smov [#allocation4]   ;;  %s94_s16 = scalar_lea.hbm %s204_s2, 384 }
   0x2   :  { %s21_s13 = sshll.u32 %s142_s12, 4  ;;  %p95_p0 = scmp.ne.s32.totalorder %s204_s2, %s94_s16  ;;  %s22_s13 = int_to_ptr.vmem [resolvable:$true] %s21_s13 }
   0x3   :  { %p98_p1 = scmp.lt.u32.totalorder %s94_s16, %s204_s2 }
   0x5   :  { %p100_p2 = pnand %p98_p1, %p95_p0 }
   0x7   :  { %103 = shalt.err (!%p100_p2)
}
   0x8   :  { %s104_s21 = scalar_lea.vmem %s22_s13, 384  ;;  %p109_p4 = scmp.lt.s32.totalorder %s22_s13, %s22_s13 }
   0x9   :  { %p105_p3 = scmp.ne.s32.totalorder %s22_s13, %s104_s21  ;;  %p110_p5 = scmp.lt.s32.totalorder %s104_s21, %s104_s21 }
   0xb   :  { %p111_p6 = por %p110_p5, %p109_p4 }
   0xd   :  { %p112_p7 = pnand %p111_p6, %p105_p3 }
   0xf   :  { %115 = shalt.err (!%p112_p7)
}
  0x10   :  { %s143_s22 = smov 128   ;;  %s144_s23 = smov 8   ;;  %v33_v0 = vstv %s202_s0 }
  0x11   :  { %27 = dma.hbm_to_vmem [thread:$0]  %s204_s2, 384, %s22_s13, [#allocation5], %s143_s22, %s143_s22, %s144_s23  }
  0x12   :  { %138 = dma.done.wait [#allocation5], 384  }
  0x13   :  { %139 = vsyncadd [#allocation5], 4294966912  ;;  %92 = vrcp.f32 %v33_v0  ;;  %v36_v2 = vld [vmem:[#allocation4] sm:$0xff]  ;;  %v37_v3 = vld [vmem:[#allocation4 + $0x8] sm:$0xff]  ;;  %v43_v6 = vstv %s203_s1  ;;  %s145_s0 = smov [#allocation7]  }
  0x14   :  { %v38_v4 = vld [vmem:[#allocation4 + $0x10] sm:$0xff]  ;;  %s71_s2 = sshll.u32 %s145_s0, 4  ;;  %s72_s2 = int_to_ptr.vmem [resolvable:$true] %s71_s2 }
  0x15   :  { %s116_s1 = scalar_lea.vmem %s72_s2, 384  ;;  %p121_p9 = scmp.lt.s32.totalorder %s72_s2, %s72_s2 }
  0x16   :  { %p117_p8 = scmp.ne.s32.totalorder %s72_s2, %s116_s1  ;;  %p122_p10 = scmp.lt.s32.totalorder %s116_s1, %s116_s1 }
  0x18   :  { %p123_p11 = por %p122_p10, %p121_p9 }
  0x1a   :  { %p124_p12 = pnand %p123_p11, %p117_p8 }
  0x1d   :  { %v93_v1 = vpop.eup %92 }
  0x1e   :  { %83 = vpush %v93_v1 }
  0x4f   :  { %s84_s28 = spop %83 }
  0x50   :  { %v39_v5 = vstv %s84_s28 }
  0x51   :  { %v40_v7 = vmul.f32 %v39_v5, %v36_v2  ;;  %v41_v8 = vmul.f32 %v39_v5, %v37_v3  ;;  %v42_v9 = vmul.f32 %v39_v5, %v38_v4 }
  0x53   :  { %v44_v10 = vadd.f32 %v43_v6, %v40_v7  ;;  %v45_v11 = vadd.f32 %v43_v6, %v41_v8  ;;  %v46_v12 = vadd.f32 %v43_v6, %v42_v9 }
  0x55   :  { %v85_v13 = vround.rtne.f32 %v44_v10  ;;  %v86_v14 = vround.rtne.f32 %v45_v11  ;;  %v87_v15 = vround.rtne.f32 %v46_v12 }
  0x57   :  { %v50_v16 = vmax.f32 %v85_v13, 0.0  ;;  %v51_v17 = vmax.f32 %v86_v14, 0.0  ;;  %v52_v18 = vmax.f32 %v87_v15, 0.0 }
  0x59   :  { %v53_v19 = vmin.f32 %v50_v16, 255.0  ;;  %v54_v20 = vmin.f32 %v51_v17, 255.0  ;;  %v55_v21 = vmin.f32 %v52_v18, 255.0 }
  0x5b   :  { %v56_v22 = vsub.f32 %v53_v19, %v43_v6  ;;  %v57_v23 = vsub.f32 %v54_v20, %v43_v6  ;;  %v58_v24 = vsub.f32 %v55_v21, %v43_v6 }
  0x5d   :  { %v60_v25 = vmul.f32 %v56_v22, %v33_v0  ;;  %v61_v26 = vmul.f32 %v57_v23, %v33_v0  ;;  %v62_v27 = vmul.f32 %v58_v24, %v33_v0 }
  0x5f   :  { %63 = vst [vmem:[#allocation7] sm:$0xff] %v60_v25  ;;  %64 = vst [vmem:[#allocation7 + $0x8] sm:$0xff] %v61_v26 }
  0x60   :  { %65 = vst [vmem:[#allocation7 + $0x10] sm:$0xff] %v62_v27 }
  0x61   :  { %127 = shalt.err (!%p124_p12)
}
  0x62   :  { %s128_s6 = scalar_lea.hbm %s205_s3, 384 }
  0x63   :  { %p129_p13 = scmp.ne.s32.totalorder %s205_s3, %s128_s6  ;;  %p132_p0 = scmp.lt.u32.totalorder %s128_s6, %s205_s3 }
  0x65   :  { %p134_p1 = pnand %p132_p0, %p129_p13 }
  0x67   :  { %137 = shalt.err (!%p134_p1)
}
  0x68   :  { %77 = dma.vmem_to_hbm [thread:$0]  %s72_s2, 384, %s205_s3, [#allocation6], %s143_s22, %s143_s22, %s144_s23  }
  0x69   :  { %140 = dma.done.wait [#allocation6], 384  }
  0x6a   :  { %141 = vsyncadd [#allocation6], 4294966912 }
  0x6b   :  { %81 = vsyncpa [#allocation5], 1 }
  0x6c   :  { %82 = vsyncpa [#allocation6], 1 }

</bundles_post_ra>
